<compile_context>
chip_gen: v6e
topology: v6e:2x2x1
jax: 0.10.0
libtpu: 0.0.40
codegen_flags: <defaults>
</compile_context>

<pallas_src>
import functools

import jax
import jax.numpy as jnp
from jax import lax
from jax.experimental import pallas as pl
from jax.experimental.pallas import tpu as pltpu

# ---- module config (mirrors StochDepthConsistencyBase.__init__ arguments) ----
PROB_START = 1.0
PROB_END = 0.5
CONSISTENCY = "prob"      # None | 'logit' | 'hidden' | 'prob'
CONSIST_FUNC = "kl"       # 'cosine'/'l2' for logit|hidden ; 'kl'/'js'/'ce' for prob
ALPHA = 1.0
STOP_GRAD = False

# ---- synthetic _forward_impl sizes ----
BATCH = 8
C_IN, HH, WW = 4, 16, 16
D_IN = C_IN * HH * WW          # 1024
HID = 128
NUM_CLASSES = 16
LANE = 128                     # lane width of the lane-dense inference logits slab
PROB_KEEP = 0.5 * (PROB_START + PROB_END)   # stochastic-depth survival prob
TILE_B = 8                     # batch tile (sublane multiple); grid = B // TILE_B


# =====================  in-kernel helpers  =====================

def _log_softmax(z):
    m = jnp.max(z, axis=1, keepdims=True)
    return z - (m + jnp.log(jnp.sum(jnp.exp(z - m), axis=1, keepdims=True)))


def _trunk(x_ref, w1_ref, b1_ref, wr_ref, br_ref):
    """Deterministic part shared by both stochastic forwards (f32 accumulation)."""
    base = jnp.dot(x_ref[...], w1_ref[...],
                   preferred_element_type=jnp.float32) + b1_ref[...]
    branch = jnp.maximum(
        jnp.dot(base.astype(jnp.bfloat16), wr_ref[...],
                preferred_element_type=jnp.float32) + br_ref[...],
        0.0)
    return base, branch


def _consist_partial(hidden1, hidden2, logits1, logits2, logp1, logp2, inv_n):
    """Per-tile (already 1/B-normalized) contribution to the consistency loss.

    Trace-time branching on the module config. For cosine the final '1 - acc'
    transform is applied at the last grid step.
    """
    if CONSISTENCY in ("logit", "hidden"):
        z1, z2 = (hidden1, hidden2) if CONSISTENCY == "hidden" else (logits1, logits2)
        if CONSIST_FUNC == "cosine":
            eps = jnp.float32(1e-8)
            n1 = jnp.maximum(jnp.sqrt(jnp.sum(z1 * z1, axis=1, keepdims=True)), eps)
            n2 = jnp.maximum(jnp.sqrt(jnp.sum(z2 * z2, axis=1, keepdims=True)), eps)
            return jnp.sum((z1 / n1) * (z2 / n2)) * inv_n          # finalize: 1 - acc
        if CONSIST_FUNC == "l2":
            d = z1 - z2
            return 0.5 * jnp.sum(d * d) * inv_n                    # finalize: acc
        raise NotImplementedError(CONSIST_FUNC)
    if CONSISTENCY == "prob":
        p1 = jnp.exp(logp1)
        p2 = jnp.exp(logp2)
        if CONSIST_FUNC == "kl":
            return 0.5 * (jnp.sum(p2 * (logp2 - logp1))
                          + jnp.sum(p1 * (logp1 - logp2))) * inv_n
        if CONSIST_FUNC == "js":
            mean = jnp.clip(0.5 * (p1 + p2), 1e-7, 1.0)
            log_mean = jnp.log(mean)
            return 0.5 * (jnp.sum(p1 * (logp1 - log_mean))
                          + jnp.sum(p2 * (logp2 - log_mean))) * inv_n
        if CONSIST_FUNC == "ce":
            return 0.5 * (-jnp.sum(p1 * logp2) - jnp.sum(p2 * logp1)) * inv_n
        raise NotImplementedError(CONSIST_FUNC)
    raise NotImplementedError(CONSISTENCY)


# =====================  Pallas kernels  =====================

def _train_kernel(x_ref, keep_ref, labels_ref,
                  w1_ref, b1_ref, wr_ref, br_ref, w2_ref, b2_ref,
                  out_ref, *, batch_total):
    """Fused training step over one batch tile.

    Accumulates into out_ref (SMEM f32[4]); at the last grid step it is
    finalized to [ce_loss1, cls_loss, consist_loss, agg_loss].
    """
    i = pl.program_id(0)
    tb = x_ref.shape[0]
    inv_n = jnp.float32(1.0 / batch_total)

    @pl.when(i == 0)
    def _init():
        out_ref[0] = jnp.float32(0.0)
        out_ref[1] = jnp.float32(0.0)
        out_ref[2] = jnp.float32(0.0)
        out_ref[3] = jnp.float32(0.0)

    base, branch = _trunk(x_ref, w1_ref, b1_ref, wr_ref, br_ref)
    keep = keep_ref[...]                                     # (tb, 2) f32, 1/p-scaled

    labels = labels_ref[...]                                 # (tb, 1) int32
    cls_iota = lax.broadcasted_iota(jnp.int32, (tb, NUM_CLASSES), 1)
    onehot = (cls_iota == labels).astype(jnp.float32)

    # ---- stochastic forward 1 + CE (always) ----
    hidden1 = base + keep[:, 0:1] * branch
    logits1 = jnp.dot(hidden1.astype(jnp.bfloat16), w2_ref[...],
                      preferred_element_type=jnp.float32) + b2_ref[...]
    logp1 = _log_softmax(logits1)
    out_ref[0] = out_ref[0] + (-jnp.sum(onehot * logp1) * inv_n)

    # ---- stochastic forward 2 + CE + consistency (trace-time gated) ----
    if CONSISTENCY is not None:
        hidden2 = base + keep[:, 1:2] * branch
        logits2 = jnp.dot(hidden2.astype(jnp.bfloat16), w2_ref[...],
                          preferred_element_type=jnp.float32) + b2_ref[...]
        logp2 = _log_softmax(logits2)
        out_ref[1] = out_ref[1] + (-jnp.sum(onehot * logp2) * inv_n)
        # NOTE: the PyTorch `if loss < loss2` ordering only changes which arg is
        # detached when STOP_GRAD=True; all loss functions here are symmetric in
        # (z1, z2) so the forward value is identical either way.
        out_ref[2] = out_ref[2] + _consist_partial(
            hidden1, hidden2, logits1, logits2, logp1, logp2, inv_n)

    @pl.when(i == pl.num_programs(0) - 1)
    def _finalize():
        loss1 = out_ref[0]
        if CONSISTENCY is None:
            out_ref[1] = loss1
            out_ref[2] = jnp.float32(0.0)
            out_ref[3] = loss1
        else:
            loss2 = out_ref[1]
            cls_loss = 0.5 * (loss1 + loss2)
            acc = out_ref[2]
            if CONSISTENCY in ("logit", "hidden") and CONSIST_FUNC == "cosine":
                consist = 1.0 - acc
            else:
                consist = acc
            out_ref[1] = cls_loss
            out_ref[2] = consist
            out_ref[3] = cls_loss + ALPHA * consist


def _infer_kernel(x_ref, w1_ref, b1_ref, wr_ref, br_ref, w2p_ref, b2p_ref, o_ref):
    """Eval-mode forward over one batch tile; lane-dense [tb, 128] logits slab."""
    base, branch = _trunk(x_ref, w1_ref, b1_ref, wr_ref, br_ref)
    # TODO(synk): eval-mode stochastic depth takes the deterministic expected
    # path (inverted scaling was applied at train time); _forward_impl is
    # abstract in the reference so eval semantics are a stand-in.
    hidden = base + branch
    o_ref[...] = jnp.dot(hidden.astype(jnp.bfloat16), w2p_ref[...],
                         preferred_element_type=jnp.float32) + b2p_ref[...]


# =====================  pallas_call wrappers  =====================

_CONST2 = lambda i: (0, 0)   # pinned (VMEM-resident) weight blocks


@jax.jit
def _train_forward(params, x, labels, keep):
    b = x.shape[0]
    assert b % TILE_B == 0
    grid = (b // TILE_B,)
    x_flat = x.reshape(b, -1).astype(jnp.bfloat16)           # NCHW -> [B, C*H*W]
    labels2d = labels.astype(jnp.int32).reshape(b, 1)

    w_bytes = (D_IN * HID + HID * HID + HID * NUM_CLASSES) * 2 \
        + (2 * HID + NUM_CLASSES) * 4
    cost = pl.CostEstimate(
        flops=2 * b * D_IN * HID + 2 * b * HID * HID
              + 2 * (2 * b * HID * NUM_CLASSES) + 20 * b * HID,
        transcendentals=6 * b * NUM_CLASSES,
        bytes_accessed=x_flat.size * 2 + keep.size * 4 + labels2d.size * 4
                       + w_bytes + 16)

    kernel = functools.partial(_train_kernel, batch_total=b)
    return pl.pallas_call(
        kernel,
        out_shape=jax.ShapeDtypeStruct((4,), jnp.float32),
        grid=grid,
        in_specs=[
            pl.BlockSpec((TILE_B, D_IN), lambda i: (i, 0)),
            pl.BlockSpec((TILE_B, 2), lambda i: (i, 0)),
            pl.BlockSpec((TILE_B, 1), lambda i: (i, 0)),
            pl.BlockSpec((D_IN, HID), _CONST2),
            pl.BlockSpec((1, HID), _CONST2),
            pl.BlockSpec((HID, HID), _CONST2),
            pl.BlockSpec((1, HID), _CONST2),
            pl.BlockSpec((HID, NUM_CLASSES), _CONST2),
            pl.BlockSpec((1, NUM_CLASSES), _CONST2),
        ],
        out_specs=pl.BlockSpec(memory_space=pltpu.MemorySpace.SMEM),
        # Loss is a full-batch reduction accumulated in the SMEM output, so the
        # batch-tile axis must be "arbitrary" (sequential) here.
        compiler_params=pltpu.CompilerParams(dimension_semantics=("arbitrary",)),
        cost_estimate=cost,
    )(x_flat, keep, labels2d,
      params["w1"], params["b1"], params["wr"], params["br"],
      params["w2"], params["b2"])


@jax.jit
def _infer_forward(params, x):
    b = x.shape[0]
    assert b % TILE_B == 0
    grid = (b // TILE_B,)
    x_flat = x.reshape(b, -1).astype(jnp.bfloat16)

    w_bytes = (D_IN * HID + HID * HID + HID * LANE) * 2 + (2 * HID + LANE) * 4
    cost = pl.CostEstimate(
        flops=2 * b * D_IN * HID + 2 * b * HID * HID + 2 * b * HID * LANE,
        transcendentals=0,
        bytes_accessed=x_flat.size * 2 + w_bytes + b * LANE * 4)

    logits_pad = pl.pallas_call(
        _infer_kernel,
        out_shape=jax.ShapeDtypeStruct((b, LANE), jnp.float32),
        grid=grid,
        in_specs=[
            pl.BlockSpec((TILE_B, D_IN), lambda i: (i, 0)),
            pl.BlockSpec((D_IN, HID), _CONST2),
            pl.BlockSpec((1, HID), _CONST2),
            pl.BlockSpec((HID, HID), _CONST2),
            pl.BlockSpec((1, HID), _CONST2),
            pl.BlockSpec((HID, LANE), _CONST2),
            pl.BlockSpec((1, LANE), _CONST2),
        ],
        out_specs=pl.BlockSpec((TILE_B, LANE), lambda i: (i, 0)),
        # Per-tile independent work: parallel axis (v7x 2-TC sharding, pipelining).
        compiler_params=pltpu.CompilerParams(dimension_semantics=("parallel",)),
        cost_estimate=cost,
    )(x_flat, params["w1"], params["b1"], params["wr"], params["br"],
      params["w2_pad"], params["b2_pad"])
    return logits_pad[:, :NUM_CLASSES]


def forward(params, x, labels=None, rng=None):
    """Mirrors StochDepthConsistencyBase.forward."""
    if labels is None:
        logits = _infer_forward(params, x)
        return logits, None
    if rng is None:
        rng = jax.random.PRNGKey(0)
    b = x.shape[0]
    # Per-sample stochastic-depth keep masks for the two forwards (inverted 1/p scaling).
    keep = (jax.random.bernoulli(rng, PROB_KEEP, (b, 2)).astype(jnp.float32)
            * jnp.float32(1.0 / PROB_KEEP))
    out = _train_forward(params, x, jnp.asarray(labels), keep)
    if CONSISTENCY is None:
        return out[0]                      # plain CE loss of the single forward
    # NOTE: PyTorch returns .item() floats for 'cls'/'csst' (host sync); we keep
    # device arrays — call float(...) outside if host values are needed.
    return {"cls": out[1], "csst": out[2], "agg": out[3]}


def init_params(key):
    """bf16 master weights + f32 biases; lane-dense padded classifier built ONCE."""
    k1, k2, k3 = jax.random.split(key, 3)
    w1 = (jax.random.normal(k1, (D_IN, HID), jnp.float32)
          * (1.0 / jnp.sqrt(D_IN))).astype(jnp.bfloat16)
    wr = (jax.random.normal(k2, (HID, HID), jnp.float32)
          * (1.0 / jnp.sqrt(HID))).astype(jnp.bfloat16)
    w2 = (jax.random.normal(k3, (HID, NUM_CLASSES), jnp.float32)
          * (1.0 / jnp.sqrt(HID))).astype(jnp.bfloat16)
    b1 = jnp.zeros((1, HID), jnp.float32)
    br = jnp.zeros((1, HID), jnp.float32)
    b2 = jnp.zeros((1, NUM_CLASSES), jnp.float32)
    w2_pad = jnp.zeros((HID, LANE), jnp.bfloat16).at[:, :NUM_CLASSES].set(w2)
    b2_pad = jnp.zeros((1, LANE), jnp.float32).at[:, :NUM_CLASSES].set(b2)
    return {"w1": w1, "b1": b1, "wr": wr, "br": br,
            "w2": w2, "b2": b2, "w2_pad": w2_pad, "b2_pad": b2_pad}


if __name__ == "__main__":
    key = jax.random.PRNGKey(0)
    kx, klab, kp, kmask = jax.random.split(key, 4)
    x = jax.random.normal(kx, (BATCH, C_IN, HH, WW), jnp.float32)   # NCHW
    labels = jax.random.randint(klab, (BATCH,), 0, NUM_CLASSES)
    params = init_params(kp)

    # inference path (labels=None): returns (logits, None)
    logits, none_hidden = forward(params, x, labels=None)
    jax.block_until_ready(logits)
    assert logits.shape == (BATCH, NUM_CLASSES) and none_hidden is None
    assert bool(jnp.all(jnp.isfinite(logits)))

    # training path: fused two stochastic forwards + CE + consistency (prob/kl)
    out = forward(params, x, labels=labels, rng=kmask)
    agg = jax.block_until_ready(out["agg"])
    assert bool(jnp.isfinite(agg))
    assert bool(jnp.isfinite(out["cls"])) and bool(jnp.isfinite(out["csst"]))
    print("KERNEL_OK")
</pallas_src>

<mosaic_0001>
module attributes {stable_mosaic.version = 11 : i64} {
  func.func @_infer_kernel(%arg0: i32, %arg1: memref<8x1024xbf16, #tpu.memory_space<vmem>>, %arg2: memref<1024x128xbf16, #tpu.memory_space<vmem>>, %arg3: memref<1x128xf32, #tpu.memory_space<vmem>>, %arg4: memref<128x128xbf16, #tpu.memory_space<vmem>>, %arg5: memref<1x128xf32, #tpu.memory_space<vmem>>, %arg6: memref<128x128xbf16, #tpu.memory_space<vmem>>, %arg7: memref<1x128xf32, #tpu.memory_space<vmem>>, %arg8: memref<8x128xf32, #tpu.memory_space<vmem>>) attributes {dimension_semantics = [#tpu.dimension_semantics<parallel>], iteration_bounds = array<i64: 1>, scalar_prefetch = 0 : i64, scratch_operands = 0 : i64, tpu.core_type = #tpu.core_type<tc>, window_params = [{transform_indices = @transform_0, window_bounds = array<i64: 8, 1024>}, {pipeline_mode = #tpu.pipeline_mode<synchronous>, transform_indices = @transform_1, window_bounds = array<i64: 1024, 128>}, {pipeline_mode = #tpu.pipeline_mode<synchronous>, transform_indices = @transform_2, window_bounds = array<i64: 1, 128>}, {pipeline_mode = #tpu.pipeline_mode<synchronous>, transform_indices = @transform_3, window_bounds = array<i64: 128, 128>}, {pipeline_mode = #tpu.pipeline_mode<synchronous>, transform_indices = @transform_4, window_bounds = array<i64: 1, 128>}, {pipeline_mode = #tpu.pipeline_mode<synchronous>, transform_indices = @transform_5, window_bounds = array<i64: 128, 128>}, {pipeline_mode = #tpu.pipeline_mode<synchronous>, transform_indices = @transform_6, window_bounds = array<i64: 1, 128>}, {transform_indices = @transform_7, window_bounds = array<i64: 8, 128>}]} {
    %c0 = arith.constant 0 : index
    %c0_0 = arith.constant 0 : index
    %0 = vector.load %arg1[%c0, %c0_0] : memref<8x1024xbf16, #tpu.memory_space<vmem>>, vector<8x1024xbf16>
    %c0_1 = arith.constant 0 : index
    %c0_2 = arith.constant 0 : index
    %1 = vector.load %arg2[%c0_1, %c0_2] : memref<1024x128xbf16, #tpu.memory_space<vmem>>, vector<1024x128xbf16>
    %cst = arith.constant dense<0.000000e+00> : vector<8x128xf32>
    %2 = tpu.matmul %0, %1, %cst {dimension_numbers = #tpu.dot_dimension_numbers<[1], [0], [0], [1], [0, 0, 1, 1], [], []>} : vector<8x1024xbf16>, vector<1024x128xbf16>, vector<8x128xf32> -> vector<8x128xf32>
    %c0_3 = arith.constant 0 : index
    %c0_4 = arith.constant 0 : index
    %3 = vector.load %arg3[%c0_3, %c0_4] : memref<1x128xf32, #tpu.memory_space<vmem>>, vector<1x128xf32>
    %4 = vector.broadcast %3 : vector<1x128xf32> to vector<8x128xf32>
    %5 = arith.addf %2, %4 : vector<8x128xf32>
    %6 = arith.truncf %5 : vector<8x128xf32> to vector<8x128xbf16>
    %c0_5 = arith.constant 0 : index
    %c0_6 = arith.constant 0 : index
    %7 = vector.load %arg4[%c0_5, %c0_6] : memref<128x128xbf16, #tpu.memory_space<vmem>>, vector<128x128xbf16>
    %cst_7 = arith.constant dense<0.000000e+00> : vector<8x128xf32>
    %8 = tpu.matmul %6, %7, %cst_7 {dimension_numbers = #tpu.dot_dimension_numbers<[1], [0], [0], [1], [0, 0, 1, 1], [], []>} : vector<8x128xbf16>, vector<128x128xbf16>, vector<8x128xf32> -> vector<8x128xf32>
    %c0_8 = arith.constant 0 : index
    %c0_9 = arith.constant 0 : index
    %9 = vector.load %arg5[%c0_8, %c0_9] : memref<1x128xf32, #tpu.memory_space<vmem>>, vector<1x128xf32>
    %10 = vector.broadcast %9 : vector<1x128xf32> to vector<8x128xf32>
    %11 = arith.addf %8, %10 : vector<8x128xf32>
    %cst_10 = arith.constant 0.000000e+00 : f32
    %12 = vector.broadcast %cst_10 : f32 to vector<8x128xf32>
    %13 = arith.maximumf %11, %12 : vector<8x128xf32>
    %14 = arith.addf %5, %13 : vector<8x128xf32>
    %15 = arith.truncf %14 : vector<8x128xf32> to vector<8x128xbf16>
    %c0_11 = arith.constant 0 : index
    %c0_12 = arith.constant 0 : index
    %16 = vector.load %arg6[%c0_11, %c0_12] : memref<128x128xbf16, #tpu.memory_space<vmem>>, vector<128x128xbf16>
    %cst_13 = arith.constant dense<0.000000e+00> : vector<8x128xf32>
    %17 = tpu.matmul %15, %16, %cst_13 {dimension_numbers = #tpu.dot_dimension_numbers<[1], [0], [0], [1], [0, 0, 1, 1], [], []>} : vector<8x128xbf16>, vector<128x128xbf16>, vector<8x128xf32> -> vector<8x128xf32>
    %c0_14 = arith.constant 0 : index
    %c0_15 = arith.constant 0 : index
    %18 = vector.load %arg7[%c0_14, %c0_15] : memref<1x128xf32, #tpu.memory_space<vmem>>, vector<1x128xf32>
    %19 = vector.broadcast %18 : vector<1x128xf32> to vector<8x128xf32>
    %20 = arith.addf %17, %19 : vector<8x128xf32>
    %c0_16 = arith.constant 0 : index
    %c0_17 = arith.constant 0 : index
    %21 = vector.load %arg8[%c0_16, %c0_17] : memref<8x128xf32, #tpu.memory_space<vmem>>, vector<8x128xf32>
    tpu.vector_store %arg8[%c0_16, %c0_17], %20 {strides = array<i32>} : memref<8x128xf32, #tpu.memory_space<vmem>>, vector<8x128xf32>,
    return
  }
  func.func @transform_0(%arg0: i32) -> (i32, i32) {
    %c0_i32 = arith.constant 0 : i32
    %c0_i32_0 = arith.constant 0 : i32
    return %arg0, %c0_i32 : i32, i32
  }
  func.func @transform_1(%arg0: i32) -> (i32, i32) {
    %c0_i32 = arith.constant 0 : i32
    %c0_i32_0 = arith.constant 0 : i32
    %c0_i32_1 = arith.constant 0 : i32
    return %c0_i32, %c0_i32_0 : i32, i32
  }
  func.func @transform_2(%arg0: i32) -> (i32, i32) {
    %c0_i32 = arith.constant 0 : i32
    %c0_i32_0 = arith.constant 0 : i32
    %c0_i32_1 = arith.constant 0 : i32
    return %c0_i32, %c0_i32_0 : i32, i32
  }
  func.func @transform_3(%arg0: i32) -> (i32, i32) {
    %c0_i32 = arith.constant 0 : i32
    %c0_i32_0 = arith.constant 0 : i32
    %c0_i32_1 = arith.constant 0 : i32
    return %c0_i32, %c0_i32_0 : i32, i32
  }
  func.func @transform_4(%arg0: i32) -> (i32, i32) {
    %c0_i32 = arith.constant 0 : i32
    %c0_i32_0 = arith.constant 0 : i32
    %c0_i32_1 = arith.constant 0 : i32
    return %c0_i32, %c0_i32_0 : i32, i32
  }
  func.func @transform_5(%arg0: i32) -> (i32, i32) {
    %c0_i32 = arith.constant 0 : i32
    %c0_i32_0 = arith.constant 0 : i32
    %c0_i32_1 = arith.constant 0 : i32
    return %c0_i32, %c0_i32_0 : i32, i32
  }
  func.func @transform_6(%arg0: i32) -> (i32, i32) {
    %c0_i32 = arith.constant 0 : i32
    %c0_i32_0 = arith.constant 0 : i32
    %c0_i32_1 = arith.constant 0 : i32
    return %c0_i32, %c0_i32_0 : i32, i32
  }
  func.func @transform_7(%arg0: i32) -> (i32, i32) {
    %c0_i32 = arith.constant 0 : i32
    %c0_i32_0 = arith.constant 0 : i32
    return %arg0, %c0_i32 : i32, i32
  }
}

</mosaic_0001>

<bundles_post_ra>
// kernel: _infer_forward.1
= control target key start
LH: loop header
LB: loop body
LE: loop exit
PB: predicated region body
PF: predicated region fallthrough
CT: control target
= control target key end

     0   :  { %s1655_s0 = inlined_call_operand.vmem [shape: bf16[8,1024], index: 0, kind: input, shape index: {}]   ;;  %s1656_s1 = inlined_call_operand.vmem [shape: bf16[1024,128], index: 1, kind: input, shape index: {}]   ;;  %s1657_s2 = inlined_call_operand.vmem [shape: f32[1,128], index: 2, kind: input, shape index: {}]   ;;  %s1658_s3 = inlined_call_operand.vmem [shape: bf16[128,128], index: 3, kind: input, shape index: {}]   ;;  %s1659_s4 = inlined_call_operand.vmem [shape: f32[1,128], index: 4, kind: input, shape index: {}]   ;;  %s1660_s5 = inlined_call_operand.vmem [shape: bf16[128,128], index: 5, kind: input, shape index: {}]   ;;  %s1661_s6 = inlined_call_operand.vmem [shape: f32[1,128], index: 6, kind: input, shape index: {}]   ;;  %s1662_s7 = inlined_call_operand.hbm [shape: f32[8,128], index: 7, kind: output, shape index: {}]  }
   0x1   :  { %v1220_v0 = vld [vmem:[%s1656_s1 + $0x78] sm:$0xff]   ;;  %v1224_v4 = vld [vmem:[%s1656_s1 + $0x70] sm:$0xff]   ;;  %v1228_v8 = vld [vmem:[%s1656_s1 + $0x68] sm:$0xff]  }
   0x2   :  { %v1221_v1 = vld [vmem:[%s1656_s1 + $0xf8] sm:$0xff]   ;;  %1071 = vmatprep.subr.bf16.mxu0 %v1220_v0  ;;  %v1225_v5 = vld [vmem:[%s1656_s1 + $0xf0] sm:$0xff]   ;;  %v1229_v9 = vld [vmem:[%s1656_s1 + $0xe8] sm:$0xff]  }
   0x3   :  { %v1222_v2 = vld [vmem:[%s1656_s1 + $0x38] sm:$0xff]   ;;  %1093 = vmatprep.subr.bf16.mxu1 %v1221_v1  ;;  %v1226_v6 = vld [vmem:[%s1656_s1 + $0x30] sm:$0xff]   ;;  %v1230_v10 = vld [vmem:[%s1656_s1 + $0x28] sm:$0xff]  }
   0x4   :  { %v1223_v3 = vld [vmem:[%s1656_s1 + $0xb8] sm:$0xff]   ;;  %1072 = vmatpush3.bf16.msra.mxu0 %v1222_v2  ;;  %v1227_v7 = vld [vmem:[%s1656_s1 + $0xb0] sm:$0xff]   ;;  %v1231_v11 = vld [vmem:[%s1656_s1 + $0xa8] sm:$0xff]  }
   0x5   :  { %1094 = vmatpush3.bf16.msra.mxu1 %v1223_v3  ;;  %1073 = vmatprep.subr.bf16.mxu0 %v1224_v4  ;;  %v1232_v12 = vld [vmem:[%s1656_s1 + $0x60] sm:$0xff]   ;;  %v1236_v16 = vld [vmem:[%s1656_s1 + $0x58] sm:$0xff]   ;;  %v1240_v20 = vld [vmem:[%s1656_s1 + $0x50] sm:$0xff]  }
   0x6   :  { %1095 = vmatprep.subr.bf16.mxu1 %v1225_v5  ;;  %v1233_v13 = vld [vmem:[%s1656_s1 + $0xe0] sm:$0xff]   ;;  %v1237_v17 = vld [vmem:[%s1656_s1 + $0xd8] sm:$0xff]   ;;  %v1241_v21 = vld [vmem:[%s1656_s1 + $0xd0] sm:$0xff]  }
   0x7   :  { %v1234_v14 = vld [vmem:[%s1656_s1 + $0x20] sm:$0xff]   ;;  %v1238_v18 = vld [vmem:[%s1656_s1 + $0x18] sm:$0xff]   ;;  %v1242_v22 = vld [vmem:[%s1656_s1 + $0x10] sm:$0xff]  }
   0x8   :  { %1074 = vmatpush3.bf16.msra.mxu0 %v1226_v6  ;;  %v1235_v15 = vld [vmem:[%s1656_s1 + $0xa0] sm:$0xff]   ;;  %v1239_v19 = vld [vmem:[%s1656_s1 + $0x98] sm:$0xff]   ;;  %v1243_v23 = vld [vmem:[%s1656_s1 + $0x90] sm:$0xff]  }
   0x9   :  { %1096 = vmatpush3.bf16.msra.mxu1 %v1227_v7  ;;  %1075 = vmatprep.subr.bf16.mxu0 %v1228_v8  ;;  %v1244_v24 = vld [vmem:[%s1656_s1 + $0x48] sm:$0xff]   ;;  %v1248_v28 = vld [vmem:[%s1656_s1 + $0x40] sm:$0xff]   ;;  %v1256_v38 = vld [vmem:[%s1656_s1 + $0x178] sm:$0xff]  }
   0xa   :  { %1097 = vmatprep.subr.bf16.mxu1 %v1229_v9  ;;  %v1245_v25 = vld [vmem:[%s1656_s1 + $0xc8] sm:$0xff]   ;;  %v1249_v29 = vld [vmem:[%s1656_s1 + $0xc0] sm:$0xff]   ;;  %v1257_v39 = vld [vmem:[%s1656_s1 + $0x1f8] sm:$0xff]  }
   0xb   :  { %v1246_v26 = vld [vmem:[%s1656_s1 + $0x8] sm:$0xff]   ;;  %v1250_v30 = vld [vmem:[%s1656_s1] sm:$0xff]   ;;  %v1258_v40 = vld [vmem:[%s1656_s1 + $0x138] sm:$0xff]  }
   0xc   :  { %1076 = vmatpush3.bf16.msra.mxu0 %v1230_v10  ;;  %v1247_v27 = vld [vmem:[%s1656_s1 + $0x88] sm:$0xff]   ;;  %v1251_v31 = vld [vmem:[%s1656_s1 + $0x80] sm:$0xff]   ;;  %v1259_v41 = vld [vmem:[%s1656_s1 + $0x1b8] sm:$0xff]  }
   0xd   :  { %1098 = vmatpush3.bf16.msra.mxu1 %v1231_v11  ;;  %1077 = vmatprep.subr.bf16.mxu0 %v1232_v12  ;;  %v28_v32 = vld [vmem:[%s1655_s0] sm:$0xff]  ;;  %v29_v33 = vld [vmem:[%s1655_s0 + $0x8] sm:$0xff]  ;;  %v1260_v42 = vld [vmem:[%s1656_s1 + $0x170] sm:$0xff]  }
   0xe   :  { %1099 = vmatprep.subr.bf16.mxu1 %v1233_v13  ;;  %v981_v34 = vcombine.low %v28_v32, %v28_v32  ;;  %v982_v35 = vcombine.high %v28_v32, %v28_v32  ;;  %v983_v36 = vcombine.low %v29_v33, %v29_v33  ;;  %v984_v37 = vcombine.high %v29_v33, %v29_v33  ;;  %v1261_v43 = vld [vmem:[%s1656_s1 + $0x1f0] sm:$0xff]   ;;  %v1264_v46 = vld [vmem:[%s1656_s1 + $0x168] sm:$0xff]   ;;  %v1268_v50 = vld [vmem:[%s1656_s1 + $0x160] sm:$0xff]  }
   0xf   :  { %v1262_v44 = vld [vmem:[%s1656_s1 + $0x130] sm:$0xff]   ;;  %v1265_v47 = vld [vmem:[%s1656_s1 + $0x1e8] sm:$0xff]   ;;  %v1269_v51 = vld [vmem:[%s1656_s1 + $0x1e0] sm:$0xff]  }
  0x10   :  { %1078 = vmatpush3.bf16.msra.mxu0 %v1234_v14  ;;  %611 = vmatprep.mubr.bf16.mxu0 %v982_v35  ;;  %v1263_v45 = vld [vmem:[%s1656_s1 + $0x1b0] sm:$0xff]   ;;  %v1266_v48 = vld [vmem:[%s1656_s1 + $0x128] sm:$0xff]   ;;  %v1270_v52 = vld [vmem:[%s1656_s1 + $0x120] sm:$0xff]  }
  0x11   :  { %1100 = vmatpush3.bf16.msra.mxu1 %v1235_v15  ;;  %1079 = vmatprep.subr.bf16.mxu0 %v1236_v16  ;;  %v1267_v49 = vld [vmem:[%s1656_s1 + $0x1a8] sm:$0xff]   ;;  %v1271_v53 = vld [vmem:[%s1656_s1 + $0x1a0] sm:$0xff]   ;;  %v1272_v54 = vld [vmem:[%s1656_s1 + $0x158] sm:$0xff]  }
  0x12   :  { %1101 = vmatprep.subr.bf16.mxu1 %v1237_v17  ;;  %651 = vmatprep.mubr.bf16.mxu1 %v984_v37  ;;  %v1273_v55 = vld [vmem:[%s1656_s1 + $0x1d8] sm:$0xff]   ;;  %v1276_v58 = vld [vmem:[%s1656_s1 + $0x150] sm:$0xff]   ;;  %v1280_v62 = vld [vmem:[%s1656_s1 + $0x148] sm:$0xff]  }
  0x13   :  { %v1274_v56 = vld [vmem:[%s1656_s1 + $0x118] sm:$0xff]   ;;  %v1277_v59 = vld [vmem:[%s1656_s1 + $0x1d0] sm:$0xff]   ;;  %v1281_v63 = vld [vmem:[%s1656_s1 + $0x1c8] sm:$0xff]  }
  0x14   :  { %1080 = vmatpush3.bf16.msra.mxu0 %v1238_v18  ;;  %v1275_v57 = vld [vmem:[%s1656_s1 + $0x198] sm:$0xff]   ;;  %v1278_v60 = vld [vmem:[%s1656_s1 + $0x110] sm:$0xff]   ;;  %v1282_v0 = vld [vmem:[%s1656_s1 + $0x108] sm:$0xff]  }
  0x15   :  { %1102 = vmatpush3.bf16.msra.mxu1 %v1239_v19  ;;  %1081 = vmatprep.subr.bf16.mxu0 %v1240_v20  ;;  %v1279_v61 = vld [vmem:[%s1656_s1 + $0x190] sm:$0xff]   ;;  %v1283_v1 = vld [vmem:[%s1656_s1 + $0x188] sm:$0xff]   ;;  %v1284_v2 = vld [vmem:[%s1656_s1 + $0x140] sm:$0xff]  }
  0x16   :  { %1103 = vmatprep.subr.bf16.mxu1 %v1241_v21  ;;  %v1285_v3 = vld [vmem:[%s1656_s1 + $0x1c0] sm:$0xff]   ;;  %v30_v6 = vld [vmem:[%s1655_s0 + $0x10] sm:$0xff]  ;;  %v31_v9 = vld [vmem:[%s1655_s0 + $0x18] sm:$0xff] }
  0x17   :  { %v1286_v4 = vld [vmem:[%s1656_s1 + $0x100] sm:$0xff]   ;;  %v985_v7 = vcombine.low %v30_v6, %v30_v6  ;;  %v986_v8 = vcombine.high %v30_v6, %v30_v6  ;;  %v987_v10 = vcombine.low %v31_v9, %v31_v9  ;;  %v988_v11 = vcombine.high %v31_v9, %v31_v9 }
  0x18   :  { %1082 = vmatpush3.bf16.msra.mxu0 %v1242_v22  ;;  %v1287_v5 = vld [vmem:[%s1656_s1 + $0x180] sm:$0xff]  }
  0x19   :  { %1104 = vmatpush3.bf16.msra.mxu1 %v1243_v23  ;;  %1083 = vmatprep.subr.bf16.mxu0 %v1244_v24 }
  0x1a   :  { %1105 = vmatprep.subr.bf16.mxu1 %v1245_v25 }
  0x1c   :  { %1084 = vmatpush3.bf16.msra.mxu0 %v1246_v26 }
  0x1d   :  { %1106 = vmatpush3.bf16.msra.mxu1 %v1247_v27  ;;  %1085 = vmatprep.subr.bf16.mxu0 %v1248_v28 }
  0x1e   :  { %1107 = vmatprep.subr.bf16.mxu1 %v1249_v29 }
  0x20   :  { %1086 = vmatpush3.bf16.msra.mxu0 %v1250_v30 }
  0x21   :  { %1108 = vmatpush3.bf16.msra.mxu1 %v1251_v31  ;;  %1115 = vmatprep.subr.bf16.mxu0 %v1256_v38 }
  0x22   :  { %1137 = vmatprep.subr.bf16.mxu1 %v1257_v39 }
  0x23   :  { %612 = vmatmul.mubr.bf16.vlgmr.msra.gmra.mxu0 %v981_v34 }
  0x24   :  { %652 = vmatmul.mubr.bf16.vlgmr.msra.gmra.mxu1 %v983_v36  ;;  %1116 = vmatpush3.bf16.msra.mxu0 %v1258_v40 }
  0x25   :  { %1138 = vmatpush3.bf16.msra.mxu1 %v1259_v41  ;;  %1117 = vmatprep.subr.bf16.mxu0 %v1260_v42 }
  0x26   :  { %1139 = vmatprep.subr.bf16.mxu1 %v1261_v43  ;;  %691 = vmatprep.mubr.bf16.mxu0 %v986_v8 }
  0x27   :  { %731 = vmatprep.mubr.bf16.mxu1 %v988_v11 }
  0x28   :  { %1118 = vmatpush3.bf16.msra.mxu0 %v1262_v44 }
  0x29   :  { %1140 = vmatpush3.bf16.msra.mxu1 %v1263_v45  ;;  %1119 = vmatprep.subr.bf16.mxu0 %v1264_v46 }
  0x2a   :  { %1141 = vmatprep.subr.bf16.mxu1 %v1265_v47 }
  0x2c   :  { %1120 = vmatpush3.bf16.msra.mxu0 %v1266_v48 }
  0x2d   :  { %1142 = vmatpush3.bf16.msra.mxu1 %v1267_v49  ;;  %1121 = vmatprep.subr.bf16.mxu0 %v1268_v50 }
  0x2e   :  { %1143 = vmatprep.subr.bf16.mxu1 %v1269_v51 }
  0x30   :  { %1122 = vmatpush3.bf16.msra.mxu0 %v1270_v52 }
  0x31   :  { %1144 = vmatpush3.bf16.msra.mxu1 %v1271_v53  ;;  %1123 = vmatprep.subr.bf16.mxu0 %v1272_v54 }
  0x32   :  { %1145 = vmatprep.subr.bf16.mxu1 %v1273_v55 }
  0x34   :  { %1124 = vmatpush3.bf16.msra.mxu0 %v1274_v56 }
  0x35   :  { %1146 = vmatpush3.bf16.msra.mxu1 %v1275_v57  ;;  %1125 = vmatprep.subr.bf16.mxu0 %v1276_v58 }
  0x36   :  { %1147 = vmatprep.subr.bf16.mxu1 %v1277_v59 }
  0x38   :  { %1126 = vmatpush3.bf16.msra.mxu0 %v1278_v60 }
  0x39   :  { %1148 = vmatpush3.bf16.msra.mxu1 %v1279_v61  ;;  %1127 = vmatprep.subr.bf16.mxu0 %v1280_v62 }
  0x3a   :  { %1149 = vmatprep.subr.bf16.mxu1 %v1281_v63 }
  0x3c   :  { %1128 = vmatpush3.bf16.msra.mxu0 %v1282_v0 }
  0x3d   :  { %1150 = vmatpush3.bf16.msra.mxu1 %v1283_v1  ;;  %1129 = vmatprep.subr.bf16.mxu0 %v1284_v2 }
  0x3e   :  { %1151 = vmatprep.subr.bf16.mxu1 %v1285_v3 }
  0x40   :  { %1130 = vmatpush3.bf16.msra.mxu0 %v1286_v4 }
  0x41   :  { %1152 = vmatpush3.bf16.msra.mxu1 %v1287_v5 }
  0x43   :  { %692 = vmatmul.mubr.bf16.vlgmr.msra.gmra.mxu0 %v985_v7 }
  0x44   :  { %732 = vmatmul.mubr.bf16.vlgmr.msra.gmra.mxu1 %v987_v10 }
  0x45   :  { %12 = vsyncpa [#allocation3], 0  ;;  %v1292_v12 = vld [vmem:[%s1658_s3 + $0x38] sm:$0xff]   ;;  %v1330_v13 = vmov 0.0   ;;  %v1293_v14 = vld [vmem:[%s1658_s3 + $0x30] sm:$0xff]   ;;  %vm1331_vm0 = vmmov 0  }
  0x46   :  { %1177 = vmatprep.subr.bf16.mxu0 %v1330_v13  ;;  %1197 = vmatprep.subr.bf16.mxu1 %v1330_v13  ;;  %v1294_v15 = vld [vmem:[%s1658_s3 + $0x28] sm:$0xff]   ;;  %v1295_v16 = vld [vmem:[%s1658_s3 + $0x20] sm:$0xff]   ;;  %v1296_v17 = vld [vmem:[%s1658_s3 + $0x18] sm:$0xff]   ;;  %s1332_s8 = smov [#allocation2]  }
  0x47   :  { %1178 = vmatpush3.bf16.msra.mxu0 %v1292_v12  ;;  %v1297_v18 = vld [vmem:[%s1658_s3 + $0x10] sm:$0xff]   ;;  %v1298_v19 = vld [vmem:[%s1658_s3 + $0x8] sm:$0xff]   ;;  %v1299_v20 = vld [vmem:[%s1658_s3] sm:$0xff]   ;;  %1193 = vmatprep.mubr.msk.bf16.mxu0 %vm1331_vm0, %v1330_v13 }
  0x48   :  { %1179 = vmatprep.subr.bf16.mxu0 %v1330_v13  ;;  %1213 = vmatprep.mubr.msk.bf16.mxu1 %vm1331_vm0, %v1330_v13  ;;  %v1300_v21 = vld [vmem:[%s1660_s5 + $0x38] sm:$0xff]   ;;  %v1301_v22 = vld [vmem:[%s1660_s5 + $0x30] sm:$0xff]   ;;  %v1302_v23 = vld [vmem:[%s1660_s5 + $0x28] sm:$0xff]  }
  0x49   :  { %1198 = vmatpush3.bf16.msra.mxu1 %v1300_v21  ;;  %v1303_v24 = vld [vmem:[%s1660_s5 + $0x20] sm:$0xff]   ;;  %v1304_v25 = vld [vmem:[%s1660_s5 + $0x18] sm:$0xff]   ;;  %v1305_v26 = vld [vmem:[%s1660_s5 + $0x10] sm:$0xff]  }
  0x4a   :  { %1199 = vmatprep.subr.bf16.mxu1 %v1330_v13  ;;  %v980_v36 = vld [vmem:[%s1657_s2] ss:$0 sm:$0xff]  ;;  %v1306_v53 = vld [vmem:[%s1660_s5 + $0x8] sm:$0xff]  }
  0x4b   :  { %1180 = vmatpush3.bf16.msra.mxu0 %v1293_v14  ;;  %v1307_v54 = vld [vmem:[%s1660_s5] sm:$0xff]   ;;  %s972_s5 = sshll.u32 %s1332_s8, 4  ;;  %s973_s5 = int_to_ptr.vmem [resolvable:$true] %s972_s5 }
  0x4c   :  { %1181 = vmatprep.subr.bf16.mxu0 %v1330_v13  ;;  %v1053_v55 = vld [vmem:[%s1659_s4] ss:$0 sm:$0xff]  ;;  %s1308_s4 = scalar_lea.vmem %s973_s5, 128  ;;  %p1313_p1 = scmp.lt.s32.totalorder %s973_s5, %s973_s5 }
  0x4d   :  { %1200 = vmatpush3.bf16.msra.mxu1 %v1301_v22  ;;  %v1062_v0 = vld [vmem:[%s1661_s6] ss:$0 sm:$0xff]  ;;  %p1309_p0 = scmp.ne.s32.totalorder %s973_s5, %s1308_s4  ;;  %p1314_p2 = scmp.lt.s32.totalorder %s1308_s4, %s1308_s4 }
  0x4e   :  { %1201 = vmatprep.subr.bf16.mxu1 %v1330_v13 }
  0x4f   :  { %1182 = vmatpush3.bf16.msra.mxu0 %v1294_v15  ;;  %p1315_p3 = por %p1314_p2, %p1313_p1 }
  0x50   :  { %1183 = vmatprep.subr.bf16.mxu0 %v1330_v13 }
  0x51   :  { %1202 = vmatpush3.bf16.msra.mxu1 %v1302_v23  ;;  %p1316_p4 = pnand %p1315_p3, %p1309_p0 }
  0x52   :  { %1203 = vmatprep.subr.bf16.mxu1 %v1330_v13 }
  0x53   :  { %1184 = vmatpush3.bf16.msra.mxu0 %v1295_v16 }
  0x54   :  { %1185 = vmatprep.subr.bf16.mxu0 %v1330_v13 }
  0x55   :  { %1204 = vmatpush3.bf16.msra.mxu1 %v1303_v24 }
  0x56   :  { %1205 = vmatprep.subr.bf16.mxu1 %v1330_v13 }
  0x57   :  { %1186 = vmatpush3.bf16.msra.mxu0 %v1296_v17 }
  0x58   :  { %1187 = vmatprep.subr.bf16.mxu0 %v1330_v13 }
  0x59   :  { %1206 = vmatpush3.bf16.msra.mxu1 %v1304_v25 }
  0x5a   :  { %1207 = vmatprep.subr.bf16.mxu1 %v1330_v13 }
  0x5b   :  { %1188 = vmatpush3.bf16.msra.mxu0 %v1297_v18 }
  0x5c   :  { %1189 = vmatprep.subr.bf16.mxu0 %v1330_v13 }
  0x5d   :  { %1208 = vmatpush3.bf16.msra.mxu1 %v1305_v26 }
  0x5e   :  { %1209 = vmatprep.subr.bf16.mxu1 %v1330_v13 }
  0x5f   :  { %1190 = vmatpush3.bf16.msra.mxu0 %v1298_v19 }
  0x60   :  { %1191 = vmatprep.subr.bf16.mxu0 %v1330_v13 }
  0x61   :  { %1210 = vmatpush3.bf16.msra.mxu1 %v1306_v53 }
  0x62   :  { %1211 = vmatprep.subr.bf16.mxu1 %v1330_v13 }
  0x63   :  { %1192 = vmatpush3.bf16.msra.mxu0 %v1299_v20 }
  0x65   :  { %1212 = vmatpush3.bf16.msra.mxu1 %v1307_v54 }
  0xe3   :  { %v1087_v27 = vpop.f32.mrf.mxu0 }
  0xe4   :  { %v1109_v28 = vpop.f32.mrf.mxu1 }
  0xe5   :  { %v1088_v29 = vpop.f32.mrf.mxu0 }
  0xe6   :  { %v1110_v30 = vpop.f32.mrf.mxu1  ;;  %v1089_v35 = vadd.f32 %v1088_v29, %v1087_v27 }
  0xe7   :  { %v1090_v31 = vpop.f32.mrf.mxu0  ;;  %v1111_v38 = vadd.f32 %v1110_v30, %v1109_v28 }
  0xe8   :  { %v1112_v32 = vpop.f32.mrf.mxu1  ;;  %v614_v37 = vadd.f32 %v1089_v35, %v980_v36 }
  0xe9   :  { %v1091_v33 = vpop.f32.mrf.mxu0 }
  0xea   :  { %v1113_v34 = vpop.f32.mrf.mxu1  ;;  %v654_v43 = vadd.f32 %v1111_v38, %v614_v37 }
 0x103   :  { %v1131_v39 = vpop.f32.mrf.mxu0 }
 0x104   :  { %v1153_v40 = vpop.f32.mrf.mxu1 }
 0x105   :  { %v1132_v41 = vpop.f32.mrf.mxu0 }
 0x106   :  { %v1154_v42 = vpop.f32.mrf.mxu1  ;;  %v1133_v44 = vadd.f32 %v1132_v41, %v1131_v39 }
 0x107   :  { %v1134_v45 = vpop.f32.mrf.mxu0  ;;  %v1155_v48 = vadd.f32 %v1154_v42, %v1153_v40 }
 0x108   :  { %v1156_v46 = vpop.f32.mrf.mxu1  ;;  %v694_v47 = vadd.f32 %v1133_v44, %v654_v43 }
 0x109   :  { %v1135_v49 = vpop.f32.mrf.mxu0 }
 0x10a   :  { %v1157_v50 = vpop.f32.mrf.mxu1  ;;  %v734_v51 = vadd.f32 %v1155_v48, %v694_v47 }
 0x10c   :  { %v739_v52 = vpack.c.bf16 %v734_v51, %v734_v51 }
 0x10e   :  { %1194 = vmatmul.mubr.bf16.vlgmr.msra.gmra.mxu0 %v739_v52 }
 0x1ce   :  { %v845_v56 = vpop.f32.mrf.mxu0 }
 0x1cf   :  { %v846_v57 = vadd.f32 %v1053_v55, %v845_v56 }
 0x1d0   :  { %v1195_v58 = vpop.f32.mrf.mxu0 }
 0x1d1   :  { %v851_v59 = vmax.f32 %v846_v57, 0.0 }
 0x1d2   :  { %v848_v60 = vpop.f32.mrf.mxu0 }
 0x1d3   :  { %v852_v61 = vadd.f32 %v851_v59, %v734_v51 }
 0x1d4   :  { %v1196_v62 = vpop.f32.mrf.mxu0 }
 0x1d5   :  { %v853_v63 = vpack.c.bf16 %v852_v61, %v852_v61 }
 0x1d7   :  { %1214 = vmatmul.mubr.bf16.vlgmr.msra.gmra.mxu1 %v853_v63 }
 0x297   :  { %v959_v1 = vpop.f32.mrf.mxu1 }
 0x298   :  { %v960_v2 = vadd.f32 %v1062_v0, %v959_v1 }
 0x299   :  { %v1215_v3 = vpop.f32.mrf.mxu1 }
 0x29a   :  { %965 = vst [vmem:[#allocation2] sm:$0xff] %v960_v2 }
 0x29b   :  { %v962_v4 = vpop.f32.mrf.mxu1 }
 0x29c   :  { %1319 = shalt.err (!%p1316_p4)
}
 0x29d   :  { %975 = dma.vmem_to_hbm [thread:$0]  %s973_s5, 128, %s1662_s7, [#allocation3]   ;;  %v1216_v5 = vpop.f32.mrf.mxu1 }
 0x29e   :  { %1328 = dma.done.wait [#allocation3], 128  }
 0x29f   :  { %1329 = vsyncadd [#allocation3], 4294967168 }
 0x2a0   :  { %979 = vsyncpa [#allocation3], 1 }

</bundles_post_ra>
